<compile_context>
chip_gen: v5e
topology: v5e:2x2
jax: 0.10.0
libtpu: 0.0.40
codegen_flags: <defaults>
</compile_context>

<pallas_src>
import jax
import jax.numpy as jnp
from jax.experimental import pallas as pl
from jax.experimental.pallas import tpu as pltpu


def _round_up(x: int, m: int) -> int:
    return (x + m - 1) // m * m


def _conv_stats_kernel(w_ref, p_ref, y_ref, stats_ref):
    """One row-tile of the convolution plus per-channel partial moments.

    w_ref:     (C_out, K*C_in)  resident weights (native dtype)
    p_ref:     (K*C_in, TM)     im2col patch tile (native dtype)
    y_ref:     (C_out, TM)      f32 conv output tile
    stats_ref: (1, C_out, 2)    per-tile [sum, sum-of-squares]
    """
    c_out = w_ref.shape[0]
    # Single deep contraction over K*C_in on the MXU; accumulate in f32.
    # No explicit upcast of the operands — MXU does native x native -> f32.
    y = jnp.dot(w_ref[...], p_ref[...], preferred_element_type=jnp.float32)
    y_ref[...] = y
    # One-pass moments while the tile is live (lane reductions -> XLU slot).
    s = jnp.sum(y, axis=1, keepdims=True)           # (C_out, 1)
    ss = jnp.sum(y * y, axis=1, keepdims=True)      # (C_out, 1)
    stats_ref[...] = jnp.concatenate([s, ss], axis=1).reshape(1, c_out, 2)


def _bn_relu_kernel(y_ref, scale_ref, shift_ref, o_ref):
    """Folded BatchNorm affine + ReLU over one row-tile.

    y_ref:     (C_out, TM)  f32 conv output tile
    scale_ref: (C_out, 1)   gamma * rsqrt(var + eps)
    shift_ref: (C_out, 1)   beta - mean * scale
    o_ref:     (C_out, TM)  output tile (input dtype)
    """
    y = y_ref[...] * scale_ref[...] + shift_ref[...]
    o_ref[...] = jnp.maximum(y, 0.0).astype(o_ref.dtype)


def conv_bn_relu_1d(x_ncl, weight, gamma, beta, *,
                    stride=1, pad=1, dilation=1, eps=1e-5, tile_m=512):
    """x_ncl: (N, C_in, L); weight: (C_out, C_in, K); gamma/beta: (C_out,).

    Returns (N, C_out, L_out), matching
    F.relu(BatchNorm1d(Conv1d(..., bias=False)(x))) in training mode.
    """
    n, c_in, l = x_ncl.shape
    c_out, _, k = weight.shape
    l_out = (l + 2 * pad - dilation * (k - 1) - 1) // stride + 1
    m = n * l_out
    kc = k * c_in

    # ---- glue (plain JAX / XLA): padding, im2col, weight reshape ----------
    # TODO(synk): for very large inputs the K-fold im2col duplication of x could
    # be built per-tile inside the kernel from a haloed x tile instead.
    x_pad = jnp.pad(x_ncl, ((0, 0), (0, 0), (pad, pad)))
    taps = []
    for kk in range(k):
        start = kk * dilation
        stop = start + (l_out - 1) * stride + 1
        taps.append(x_pad[:, :, start:stop:stride])      # (N, C_in, L_out)
    patches = jnp.stack(taps, axis=0)                    # (K, N, C_in, L_out)
    patches = jnp.transpose(patches, (0, 2, 1, 3))       # (K, C_in, N, L_out)
    patches = patches.reshape(kc, m)                     # (K*C_in, N*L_out)

    # Lane-dense row tiles: fused N*L axis tiled in multiples of 128.
    tile_m = _round_up(tile_m, 128)
    tm = min(tile_m, _round_up(m, 128))
    m_pad = _round_up(m, tm)
    if m_pad != m:
        # Zero patch columns -> zero conv output -> no effect on sum/sumsq.
        patches = jnp.pad(patches, ((0, 0), (0, m_pad - m)))
    n_tiles = m_pad // tm

    # (C_out, K*C_in) weight, kept in the native input dtype for the MXU.
    w_t = jnp.transpose(weight, (0, 2, 1)).reshape(c_out, kc).astype(x_ncl.dtype)

    cparams = pltpu.CompilerParams(
        dimension_semantics=("parallel",),
        vmem_limit_bytes=32 * 1024 * 1024,
    )

    # ---- phase 1: conv + per-tile per-channel moments ----------------------
    y_f32, stats = pl.pallas_call(
        _conv_stats_kernel,
        out_shape=(
            jax.ShapeDtypeStruct((c_out, m_pad), jnp.float32),
            jax.ShapeDtypeStruct((n_tiles, c_out, 2), jnp.float32),
        ),
        grid=(n_tiles,),
        in_specs=[
            pl.BlockSpec((c_out, kc), lambda i: (0, 0)),     # resident weights
            pl.BlockSpec((kc, tm), lambda i: (0, i)),        # pipelined patches
        ],
        out_specs=(
            pl.BlockSpec((c_out, tm), lambda i: (0, i)),
            pl.BlockSpec((1, c_out, 2), lambda i: (i, 0, 0)),
        ),
        compiler_params=cparams,
    )(w_t, patches)

    # ---- tiny global reduction + BN folding (C_out-sized, plain JAX) -------
    tot = jnp.sum(stats, axis=0)                       # (C_out, 2)
    mean = tot[:, 0] / m
    var = tot[:, 1] / m - mean * mean                  # biased var (training)
    inv_std = jax.lax.rsqrt(var + eps)
    scale = gamma.astype(jnp.float32) * inv_std
    shift = beta.astype(jnp.float32) - mean * scale
    scale2 = scale.reshape(c_out, 1)
    shift2 = shift.reshape(c_out, 1)

    # ---- phase 2: scale/shift + ReLU sweep ---------------------------------
    out_flat = pl.pallas_call(
        _bn_relu_kernel,
        out_shape=jax.ShapeDtypeStruct((c_out, m_pad), x_ncl.dtype),
        grid=(n_tiles,),
        in_specs=[
            pl.BlockSpec((c_out, tm), lambda i: (0, i)),
            pl.BlockSpec((c_out, 1), lambda i: (0, 0)),
            pl.BlockSpec((c_out, 1), lambda i: (0, 0)),
        ],
        out_specs=pl.BlockSpec((c_out, tm), lambda i: (0, i)),
        compiler_params=cparams,
    )(y_f32, scale2, shift2)

    out = out_flat[:, :m].reshape(c_out, n, l_out)
    return jnp.transpose(out, (1, 0, 2))               # (N, C_out, L_out)


if __name__ == "__main__":
    key = jax.random.PRNGKey(0)
    k_x, k_w, k_g, k_b = jax.random.split(key, 4)

    N, C_IN, C_OUT, L, K = 2, 4, 8, 16, 3

    x = jax.random.normal(k_x, (N, C_IN, L), dtype=jnp.float32)
    # Conv1d weight: (out_channels, in_channels, kernel_size), bias=False
    weight = jax.random.normal(k_w, (C_OUT, C_IN, K), dtype=jnp.float32) * 0.1
    # BatchNorm1d affine params (non-trivial to exercise the affine path)
    gamma = 1.0 + 0.1 * jax.random.normal(k_g, (C_OUT,), dtype=jnp.float32)
    beta = 0.1 * jax.random.normal(k_b, (C_OUT,), dtype=jnp.float32)

    out = conv_bn_relu_1d(x, weight, gamma, beta, stride=1, pad=1, dilation=1)
    out = jax.block_until_ready(out)

    assert out.shape == (N, C_OUT, L), out.shape
    assert bool(jnp.all(jnp.isfinite(out))), "non-finite output"
    assert bool(jnp.all(out >= 0.0)), "ReLU violated"
    print("KERNEL_OK")
</pallas_src>

<mosaic_0001>
module attributes {stable_mosaic.version = 11 : i64} {
  func.func @_conv_stats_kernel(%arg0: i32, %arg1: memref<8x12xf32, #tpu.memory_space<vmem>>, %arg2: memref<12x128xf32, #tpu.memory_space<vmem>>, %arg3: memref<8x128xf32, #tpu.memory_space<vmem>>, %arg4: memref<1x8x2xf32, #tpu.memory_space<vmem>>) attributes {dimension_semantics = [#tpu.dimension_semantics<parallel>], iteration_bounds = array<i64: 1>, scalar_prefetch = 0 : i64, scratch_operands = 0 : i64, tpu.core_type = #tpu.core_type<tc>, window_params = [{pipeline_mode = #tpu.pipeline_mode<synchronous>, transform_indices = @transform_0, window_bounds = array<i64: 8, 12>}, {transform_indices = @transform_1, window_bounds = array<i64: 12, 128>}, {transform_indices = @transform_2, window_bounds = array<i64: 8, 128>}, {transform_indices = @transform_3, window_bounds = array<i64: 1, 8, 2>}]} {
    %c0 = arith.constant 0 : index
    %c0_0 = arith.constant 0 : index
    %0 = vector.load %arg1[%c0, %c0_0] : memref<8x12xf32, #tpu.memory_space<vmem>>, vector<8x12xf32>
    %c0_1 = arith.constant 0 : index
    %c0_2 = arith.constant 0 : index
    %1 = vector.load %arg2[%c0_1, %c0_2] : memref<12x128xf32, #tpu.memory_space<vmem>>, vector<12x128xf32>
    %cst = arith.constant dense<0.000000e+00> : vector<8x128xf32>
    %2 = tpu.matmul %0, %1, %cst {dimension_numbers = #tpu.dot_dimension_numbers<[1], [0], [0], [1], [0, 0, 1, 1], [], []>} : vector<8x12xf32>, vector<12x128xf32>, vector<8x128xf32> -> vector<8x128xf32>
    %c0_3 = arith.constant 0 : index
    %c0_4 = arith.constant 0 : index
    %3 = vector.load %arg3[%c0_3, %c0_4] : memref<8x128xf32, #tpu.memory_space<vmem>>, vector<8x128xf32>
    tpu.vector_store %arg3[%c0_3, %c0_4], %2 {strides = array<i32>} : memref<8x128xf32, #tpu.memory_space<vmem>>, vector<8x128xf32>,
    %cst_5 = arith.constant dense<0.000000e+00> : vector<8xf32>
    %4 = vector.multi_reduction <add>, %2, %cst_5 [1] : vector<8x128xf32> to vector<8xf32>
    %5 = vector.shape_cast %4 : vector<8xf32> to vector<8x1xf32>
    %6 = arith.mulf %2, %2 : vector<8x128xf32>
    %cst_6 = arith.constant dense<0.000000e+00> : vector<8xf32>
    %7 = vector.multi_reduction <add>, %6, %cst_6 [1] : vector<8x128xf32> to vector<8xf32>
    %8 = vector.shape_cast %7 : vector<8xf32> to vector<8x1xf32>
    %9 = tpu.concatenate %5, %8 in 1 : vector<8x1xf32>, vector<8x1xf32> -> vector<8x2xf32>
    %10 = vector.shape_cast %9 : vector<8x2xf32> to vector<1x8x2xf32>
    %c0_7 = arith.constant 0 : index
    %c0_8 = arith.constant 0 : index
    %c0_9 = arith.constant 0 : index
    %11 = vector.load %arg4[%c0_7, %c0_8, %c0_9] : memref<1x8x2xf32, #tpu.memory_space<vmem>>, vector<1x8x2xf32>
    tpu.vector_store %arg4[%c0_7, %c0_8, %c0_9], %10 {strides = array<i32>} : memref<1x8x2xf32, #tpu.memory_space<vmem>>, vector<1x8x2xf32>,
    return
  }
  func.func @transform_0(%arg0: i32) -> (i32, i32) {
    %c0_i32 = arith.constant 0 : i32
    %c0_i32_0 = arith.constant 0 : i32
    %c0_i32_1 = arith.constant 0 : i32
    return %c0_i32, %c0_i32_0 : i32, i32
  }
  func.func @transform_1(%arg0: i32) -> (i32, i32) {
    %c0_i32 = arith.constant 0 : i32
    %c0_i32_0 = arith.constant 0 : i32
    return %c0_i32, %arg0 : i32, i32
  }
  func.func @transform_2(%arg0: i32) -> (i32, i32) {
    %c0_i32 = arith.constant 0 : i32
    %c0_i32_0 = arith.constant 0 : i32
    return %c0_i32, %arg0 : i32, i32
  }
  func.func @transform_3(%arg0: i32) -> (i32, i32, i32) {
    %c0_i32 = arith.constant 0 : i32
    %c0_i32_0 = arith.constant 0 : i32
    %c0_i32_1 = arith.constant 0 : i32
    return %arg0, %c0_i32, %c0_i32_0 : i32, i32, i32
  }
}

</mosaic_0001>

<bundles_post_ra>
// kernel: tpu_custom_call.1
= control target key start
LH: loop header
LB: loop body
LE: loop exit
PB: predicated region body
PF: predicated region fallthrough
CT: control target
= control target key end

     0   :  { %9 = vsyncpa [#allocation3], 0  ;;  %s229_s0 = inlined_call_operand.hbm [shape: f32[8,12], index: 0, kind: input, shape index: {}]   ;;  %s230_s1 = inlined_call_operand.hbm [shape: f32[12,128], index: 1, kind: input, shape index: {}]   ;;  %s231_s2 = inlined_call_operand.hbm [shape: f32[8,128], index: 2, kind: output, shape index: {0}]   ;;  %s232_s3 = inlined_call_operand.vmem [shape: f32[1,8,2], index: 3, kind: output, shape index: {1}]  }
   0x1   :  { %10 = vsyncpa [#allocation6], 0 }
   0x2   :  { %11 = vsyncpa [#allocation4], 0  ;;  %s17_s14 = sshll.u32 %s229_s0, 4  ;;  %s192_s15 = smov [#allocation2]   ;;  %s18_s14 = int_to_ptr.hbm [resolvable:$true] %s17_s14 }
   0x3   :  { %s19_s16 = sshll.u32 %s192_s15, 4  ;;  %s27_s19 = sshll.u32 %s230_s1, 4  ;;  %s20_s16 = int_to_ptr.vmem [resolvable:$true] %s19_s16  ;;  %s28_s19 = int_to_ptr.hbm [resolvable:$true] %s27_s19 }
   0x4   :  { %22 = dma.hbm_to_vmem [thread:$0]  %s18_s14, 128, %s20_s16, [#allocation3]  }
   0x5   :  { %s193_s20 = smov [#allocation5]   ;;  %s194_s22 = smov 128  }
   0x6   :  { %s29_s21 = sshll.u32 %s193_s20, 4  ;;  %s195_s23 = smov 8   ;;  %s30_s21 = int_to_ptr.vmem [resolvable:$true] %s29_s21 }
   0x7   :  { %35 = dma.hbm_to_vmem [thread:$0]  %s28_s19, 256, %s30_s21, [#allocation6], %s194_s22, %s194_s22, %s195_s23  }
   0x8   :  { %186 = dma.done.wait [#allocation3], 128  }
   0x9   :  { %187 = vsyncadd [#allocation3], 4294967168 }
   0xa   :  { %188 = dma.done.wait [#allocation6], 256  }
   0xb   :  { %189 = vsyncadd [#allocation6], 4294967040  ;;  %vm51_vm0 = vcmask 1043456   ;;  %v46_v0 = vld [vmem:[#allocation5 + $0x8] sm:$0xf]  ;;  %v45_v1 = vld [vmem:[#allocation5] sm:$0xff] }
   0xc   :  { %107 = vmatpush.msk.msra.mxu0 %vm51_vm0, %v46_v0  ;;  %v44_v2 = vld [vmem:[#allocation2] sm:$0xff]  ;;  %vm47_vm1 = vcmask 97280   ;;  %s196_s0 = smov [#allocation7]   ;;  %s92_s26 = sshll.u32 %s231_s2, 4  ;;  %vm81_vm2 = vcmask 7168   ;;  %vm83_vm3 = vcmask 15360   ;;  %s93_s26 = int_to_ptr.hbm [resolvable:$true] %s92_s26 }
   0xd   :  { %s90_s1 = sshll.u32 %s196_s0, 4  ;;  %s91_s1 = int_to_ptr.vmem [resolvable:$true] %s90_s1 }
   0xe   :  { %70 = vmatpush.msra.mxu0 %v45_v1 }
   0xf   :  { %108 = vmatmul.msk.f32.vlgmr.msra.gmra.mxu0 %vm47_vm1, %v44_v2 }
  0x8c   :  { %v72_v3 = vpop.f32.mrf.mxu0 }
  0x8d   :  { %75 = vst [vmem:[#allocation7] sm:$0xff] %v72_v3  ;;  %76 = vadd.xlane.f32.xlu0 %v72_v3  ;;  %v78_v4 = vmul.f32 %v72_v3, %v72_v3 }
  0x8e   :  { %95 = dma.vmem_to_hbm [thread:$0]  %s91_s1, 128, %s93_s26, [#allocation4]  }
  0x95   :  { %79 = vadd.xlane.f32.xlu0 %v78_v4 }
 0x100   :  { %v77_v5 = vpop.xlane.xlu0 %76 }
 0x108   :  { %v80_v6 = vpop.xlane.xlu0 %79 }
 0x109   :  { %v82_v7 = vsel %vm81_vm2, %v77_v5, %v80_v6 }
 0x10a   :  { %84 = vst.msk [vmem:[%s232_s3] sm:$0xff] %vm83_vm3, %v82_v7 }
 0x10b   :  { %190 = dma.done.wait [#allocation4], 128  }
 0x10c   :  { %191 = vsyncadd [#allocation4], 4294967168 }
 0x10d   :  { %104 = vsyncpa [#allocation3], 1 }
 0x10e   :  { %105 = vsyncpa [#allocation6], 1 }
 0x10f   :  { %106 = vsyncpa [#allocation4], 1 }

</bundles_post_ra>
